<compile_context>
chip_gen: v7x
topology: tpu7x:2x2x1
jax: 0.10.0
libtpu: 0.0.40
codegen_flags: <defaults>
</compile_context>

<pallas_src>
import functools

import jax
import jax.numpy as jnp
from jax.experimental import pallas as pl
from jax.experimental.pallas import tpu as pltpu

LANES = 128
SUBLANES = 8


def _round_up(x, m):
    return (x + m - 1) // m * m


def _pad2d(x, rows, cols):
    return jnp.pad(x.astype(jnp.float32),
                   ((0, rows - x.shape[0]), (0, cols - x.shape[1])))


def choose_block_b(batch, max_block=256):
    """Pick a batch tile: as large as possible, but >=2 blocks when batch allows
    (so v7x megacore shards the 'parallel' axis across both TensorCores)."""
    bp = _round_up(batch, SUBLANES)
    if bp >= 2 * max_block:
        return max_block
    if bp >= 2 * SUBLANES:
        return min(_round_up((bp + 1) // 2, SUBLANES), max_block)
    return bp


# -----------------------------------------------------------------------------
# Kernel: one agent step for one batch tile.
# Weight slab column layout (all offsets are multiples of 128 lanes):
#   [0:Hp)        fc1_w^T          (rows 0:INp)
#   [Hp:4Hp)      w_ih^T  gates [r | z | n], each gate lane-aligned (rows 0:Hp)
#   [4Hp:7Hp)     w_hh^T  gates [r | z | n]                         (rows 0:Hp)
#   [7Hp:7Hp+Ap)  fc2_w^T                                           (rows 0:Hp)
# Bias slab rows: [fc1_b, b_ih, b_hh, fc2_b + l2, 0...]
# -----------------------------------------------------------------------------
def rnn_agent_kernel(inp_ref, h_ref, w_ref, b_ref, loss_ref, hout_ref):
    INp = inp_ref.shape[1]
    Hp = hout_ref.shape[1]
    Ap = loss_ref.shape[1]
    wdt = w_ref.dtype

    inp = inp_ref[...]
    h_in = h_ref[...]

    fc1_b = b_ref[0:1, 0:Hp]
    b_ih = b_ref[1:2, 0:3 * Hp]
    b_hh = b_ref[2:3, 0:3 * Hp]
    fc2_b = b_ref[3:4, 0:Ap]          # already contains the precomputed L2 scalar

    fc1w = w_ref[0:INp, 0:Hp]
    wih = w_ref[0:Hp, Hp:4 * Hp]
    whh = w_ref[0:Hp, 4 * Hp:7 * Hp]
    fc2w = w_ref[0:Hp, 7 * Hp:7 * Hp + Ap]

    # fc1 + ReLU
    x = jnp.dot(inp.astype(wdt), fc1w, preferred_element_type=jnp.float32) + fc1_b
    x = jnp.maximum(x, 0.0)

    # GRUCell (PyTorch semantics); gate blocks live at lane offsets 0 / Hp / 2*Hp.
    gi = jnp.dot(x.astype(wdt), wih, preferred_element_type=jnp.float32) + b_ih
    gh = jnp.dot(h_in.astype(wdt), whh, preferred_element_type=jnp.float32) + b_hh

    r = jax.nn.sigmoid(gi[:, 0:Hp] + gh[:, 0:Hp])
    z = jax.nn.sigmoid(gi[:, Hp:2 * Hp] + gh[:, Hp:2 * Hp])
    n = jnp.tanh(gi[:, 2 * Hp:3 * Hp] + r * gh[:, 2 * Hp:3 * Hp])
    h = n + z * (h_in - n)            # == (1-z)*n + z*h_in

    # fc2 (+ L2 scalar folded into fc2_b)
    q = jnp.dot(h.astype(wdt), fc2w, preferred_element_type=jnp.float32) + fc2_b

    loss_ref[...] = q
    hout_ref[...] = h


# -----------------------------------------------------------------------------
# One-time (per parameter update) preprocessing. Not on the per-step path.
# -----------------------------------------------------------------------------
def prepare_params(params, param_dtype=jnp.float32):
    H = params["fc1_b"].shape[0]
    IN = params["fc1_w"].shape[1]
    A = params["fc2_b"].shape[0]

    Hp = _round_up(H, LANES)
    INp = _round_up(IN, LANES)
    Ap = _round_up(A, LANES)
    Rp = max(INp, Hp)
    Wtot = 7 * Hp + Ap

    f32 = jnp.float32

    def gate_pack_w(w):
        # (3H, H) rows [r; z; n] -> (Hp, 3*Hp) columns, each gate lane-aligned,
        # padded cols/rows exactly zero (keeps padded h lanes identically zero).
        wt = w.T.astype(f32)  # (H, 3H)
        out = jnp.zeros((Hp, 3 * Hp), f32)
        for g in range(3):
            out = out.at[:H, g * Hp:g * Hp + H].set(wt[:, g * H:(g + 1) * H])
        return out

    def gate_pack_b(b):
        out = jnp.zeros((3 * Hp,), f32)
        for g in range(3):
            out = out.at[g * Hp:g * Hp + H].set(b[g * H:(g + 1) * H].astype(f32))
        return out

    # L2 term depends only on params -> compute once, fold into fc2 bias.
    l2 = 0.001 * sum(jnp.sqrt(jnp.sum(p.astype(f32) ** 2)) for p in params.values())

    w_slab = jnp.zeros((Rp, Wtot), f32)
    w_slab = w_slab.at[:IN, 0:H].set(params["fc1_w"].T.astype(f32))
    w_slab = w_slab.at[:Hp, Hp:4 * Hp].set(gate_pack_w(params["w_ih"]))
    w_slab = w_slab.at[:Hp, 4 * Hp:7 * Hp].set(gate_pack_w(params["w_hh"]))
    w_slab = w_slab.at[:H, 7 * Hp:7 * Hp + A].set(params["fc2_w"].T.astype(f32))
    w_slab = w_slab.astype(param_dtype)

    bw = max(3 * Hp, Ap)
    biases = jnp.zeros((SUBLANES, bw), f32)
    biases = biases.at[0, :H].set(params["fc1_b"].astype(f32))
    biases = biases.at[1, :3 * Hp].set(gate_pack_b(params["b_ih"]))
    biases = biases.at[2, :3 * Hp].set(gate_pack_b(params["b_hh"]))
    biases = biases.at[3, :A].set(params["fc2_b"].astype(f32) + l2)

    return {"w_slab": w_slab, "biases": biases}


# -----------------------------------------------------------------------------
# Per-step forward on persistent PADDED buffers (the fast path).
# -----------------------------------------------------------------------------
@functools.partial(jax.jit, static_argnames=("block_b",))
def rnn_agent_forward_padded(inp_p, h_p, w_slab, biases, *, block_b):
    Bp, INp = inp_p.shape
    _, Hp = h_p.shape
    Rp, Wtot = w_slab.shape
    Ap = Wtot - 7 * Hp
    assert Bp % block_b == 0
    nb = Bp // block_b

    loss_p, h_out_p = pl.pallas_call(
        rnn_agent_kernel,
        grid=(nb,),
        in_specs=[
            pl.BlockSpec((block_b, INp), lambda i: (i, 0)),        # inputs
            pl.BlockSpec((block_b, Hp), lambda i: (i, 0)),         # hidden in
            pl.BlockSpec((Rp, Wtot), lambda i: (0, 0)),            # fused weight slab
            pl.BlockSpec(biases.shape, lambda i: (0, 0)),          # bias slab
        ],
        out_specs=(
            pl.BlockSpec((block_b, Ap), lambda i: (i, 0)),         # loss (q + l2)
            pl.BlockSpec((block_b, Hp), lambda i: (i, 0)),         # hidden out
        ),
        out_shape=(
            jax.ShapeDtypeStruct((Bp, Ap), jnp.float32),
            jax.ShapeDtypeStruct((Bp, Hp), jnp.float32),
        ),
        input_output_aliases={1: 1},   # hidden state updated in place
        compiler_params=pltpu.CompilerParams(
            dimension_semantics=("parallel",),
        ),
    )(inp_p, h_p, w_slab, biases)

    return loss_p, h_out_p


# Convenience wrapper with the module's (unpadded) API. One-off use only: steady
# state callers should keep padded buffers and call rnn_agent_forward_padded.
def rnn_agent_forward(inputs, hidden_state, prep, *, hidden_dim, n_actions,
                      max_block=256):
    H, A = hidden_dim, n_actions
    B, IN = inputs.shape
    INp = _round_up(IN, LANES)
    Hp = _round_up(H, LANES)
    block_b = choose_block_b(B, max_block)
    Bp = _round_up(_round_up(B, SUBLANES), block_b)

    inp_p = _pad2d(inputs, Bp, INp)
    h_p = _pad2d(jnp.reshape(hidden_state, (-1, H)), Bp, Hp)
    loss_p, h_out_p = rnn_agent_forward_padded(
        inp_p, h_p, prep["w_slab"], prep["biases"], block_b=block_b)
    return loss_p[:B, :A], h_out_p[:B, :H]


# -----------------------------------------------------------------------------
# Parameter init (mirrors the PyTorch module) and pure-JAX reference.
# -----------------------------------------------------------------------------
def init_params(key, input_shape, hidden_dim, n_actions):
    ks = jax.random.split(key, 8)

    def xavier_uniform(k, shape):
        fan_out, fan_in = shape
        bound = jnp.sqrt(6.0 / (fan_in + fan_out))
        return jax.random.uniform(k, shape, jnp.float32, -bound, bound)

    gru_bound = 1.0 / jnp.sqrt(jnp.float32(hidden_dim))

    return {
        "fc1_w": xavier_uniform(ks[0], (hidden_dim, input_shape)),
        "fc1_b": jnp.full((hidden_dim,), 0.1, jnp.float32),
        "w_ih": jax.random.uniform(ks[1], (3 * hidden_dim, hidden_dim), jnp.float32,
                                   -gru_bound, gru_bound),
        "w_hh": jax.random.uniform(ks[2], (3 * hidden_dim, hidden_dim), jnp.float32,
                                   -gru_bound, gru_bound),
        "b_ih": jax.random.uniform(ks[3], (3 * hidden_dim,), jnp.float32,
                                   -gru_bound, gru_bound),
        "b_hh": jax.random.uniform(ks[4], (3 * hidden_dim,), jnp.float32,
                                   -gru_bound, gru_bound),
        "fc2_w": xavier_uniform(ks[5], (n_actions, hidden_dim)),
        "fc2_b": jnp.full((n_actions,), 0.1, jnp.float32),
    }


def reference_forward(inputs, hidden_state, params):
    H = params["fc1_b"].shape[0]
    x = jax.nn.relu(inputs @ params["fc1_w"].T + params["fc1_b"])
    h_in = hidden_state.reshape(-1, H)
    gi = x @ params["w_ih"].T + params["b_ih"]
    gh = h_in @ params["w_hh"].T + params["b_hh"]
    r = jax.nn.sigmoid(gi[:, :H] + gh[:, :H])
    z = jax.nn.sigmoid(gi[:, H:2 * H] + gh[:, H:2 * H])
    n = jnp.tanh(gi[:, 2 * H:] + r * gh[:, 2 * H:])
    h = (1 - z) * n + z * h_in
    q = h @ params["fc2_w"].T + params["fc2_b"]
    l2 = sum(jnp.sqrt(jnp.sum(p ** 2)) for p in params.values())
    return q + 0.001 * l2, h


if __name__ == "__main__":
    B, IN, H, A = 4, 16, 32, 8
    key = jax.random.PRNGKey(0)
    k_inp, k_hid, k_par = jax.random.split(key, 3)

    inputs = jax.random.normal(k_inp, (B, IN), jnp.float32)
    hidden = jax.random.normal(k_hid, (B, H), jnp.float32)
    params = init_params(k_par, IN, H, A)

    prep = prepare_params(params)          # one-time (per parameter update)

    # Persistent padded layout: pad once, carry padded state across steps.
    INp, Hp, Ap = _round_up(IN, LANES), _round_up(H, LANES), _round_up(A, LANES)
    block_b = choose_block_b(B)
    Bp = _round_up(_round_up(B, SUBLANES), block_b)

    inp_p = _pad2d(inputs, Bp, INp)
    h_p = _pad2d(hidden.reshape(-1, H), Bp, Hp)

    # Step 1
    q1_p, h_p = rnn_agent_forward_padded(inp_p, h_p, prep["w_slab"],
                                         prep["biases"], block_b=block_b)
    # Step 2 — padded hidden state fed straight back in (no pad/slice per step).
    q2_p, h2_p = rnn_agent_forward_padded(inp_p, h_p, prep["w_slab"],
                                          prep["biases"], block_b=block_b)
    q1_p, h_p, q2_p, h2_p = jax.block_until_ready((q1_p, h_p, q2_p, h2_p))

    ref_q1, ref_h1 = reference_forward(inputs, hidden, params)
    ref_q2, ref_h2 = reference_forward(inputs, ref_h1, params)

    q1, h1 = q1_p[:B, :A], h_p[:B, :H]
    q2, h2 = q2_p[:B, :A], h2_p[:B, :H]

    assert q1.shape == (B, A) and h1.shape == (B, H)
    assert jnp.allclose(q1, ref_q1, atol=1e-4, rtol=1e-4)
    assert jnp.allclose(h1, ref_h1, atol=1e-4, rtol=1e-4)
    assert jnp.allclose(q2, ref_q2, atol=1e-4, rtol=1e-4)
    assert jnp.allclose(h2, ref_h2, atol=1e-4, rtol=1e-4)

    print("KERNEL_OK")
</pallas_src>

<mosaic_0001>
module attributes {stable_mosaic.version = 11 : i64} {
  func.func @rnn_agent_kernel(%arg0: i32, %arg1: memref<8x128xf32, #tpu.memory_space<vmem>>, %arg2: memref<8x128xf32, #tpu.memory_space<vmem>>, %arg3: memref<128x1024xf32, #tpu.memory_space<vmem>>, %arg4: memref<8x384xf32, #tpu.memory_space<vmem>>, %arg5: memref<8x128xf32, #tpu.memory_space<vmem>>, %arg6: memref<8x128xf32, #tpu.memory_space<vmem>>) attributes {dimension_semantics = [#tpu.dimension_semantics<parallel>], iteration_bounds = array<i64: 1>, scalar_prefetch = 0 : i64, scratch_operands = 0 : i64, tpu.core_type = #tpu.core_type<tc>, window_params = [{transform_indices = @transform_0, window_bounds = array<i64: 8, 128>}, {transform_indices = @transform_1, window_bounds = array<i64: 8, 128>}, {pipeline_mode = #tpu.pipeline_mode<synchronous>, transform_indices = @transform_2, window_bounds = array<i64: 128, 1024>}, {pipeline_mode = #tpu.pipeline_mode<synchronous>, transform_indices = @transform_3, window_bounds = array<i64: 8, 384>}, {transform_indices = @transform_4, window_bounds = array<i64: 8, 128>}, {transform_indices = @transform_5, window_bounds = array<i64: 8, 128>}]} {
    %c0 = arith.constant 0 : index
    %c0_0 = arith.constant 0 : index
    %0 = vector.load %arg1[%c0, %c0_0] : memref<8x128xf32, #tpu.memory_space<vmem>>, vector<8x128xf32>
    %c0_1 = arith.constant 0 : index
    %c0_2 = arith.constant 0 : index
    %1 = vector.load %arg2[%c0_1, %c0_2] : memref<8x128xf32, #tpu.memory_space<vmem>>, vector<8x128xf32>
    %c0_3 = arith.constant 0 : index
    %c0_4 = arith.constant 0 : index
    %2 = vector.load %arg4[%c0_3, %c0_4] : memref<8x384xf32, #tpu.memory_space<vmem>>, vector<1x128xf32>
    %c1 = arith.constant 1 : index
    %c0_5 = arith.constant 0 : index
    %3 = vector.load %arg4[%c1, %c0_5] : memref<8x384xf32, #tpu.memory_space<vmem>>, vector<1x384xf32>
    %c2 = arith.constant 2 : index
    %c0_6 = arith.constant 0 : index
    %4 = vector.load %arg4[%c2, %c0_6] : memref<8x384xf32, #tpu.memory_space<vmem>>, vector<1x384xf32>
    %c3 = arith.constant 3 : index
    %c0_7 = arith.constant 0 : index
    %5 = vector.load %arg4[%c3, %c0_7] : memref<8x384xf32, #tpu.memory_space<vmem>>, vector<1x128xf32>
    %c0_8 = arith.constant 0 : index
    %c0_9 = arith.constant 0 : index
    %6 = vector.load %arg3[%c0_8, %c0_9] : memref<128x1024xf32, #tpu.memory_space<vmem>>, vector<128x128xf32>
    %c0_10 = arith.constant 0 : index
    %c128 = arith.constant 128 : index
    %7 = vector.load %arg3[%c0_10, %c128] : memref<128x1024xf32, #tpu.memory_space<vmem>>, vector<128x384xf32>
    %c0_11 = arith.constant 0 : index
    %c512 = arith.constant 512 : index
    %8 = vector.load %arg3[%c0_11, %c512] : memref<128x1024xf32, #tpu.memory_space<vmem>>, vector<128x384xf32>
    %c0_12 = arith.constant 0 : index
    %c896 = arith.constant 896 : index
    %9 = vector.load %arg3[%c0_12, %c896] : memref<128x1024xf32, #tpu.memory_space<vmem>>, vector<128x128xf32>
    %cst = arith.constant dense<0.000000e+00> : vector<8x128xf32>
    %10 = tpu.matmul %0, %6, %cst {dimension_numbers = #tpu.dot_dimension_numbers<[1], [0], [0], [1], [0, 0, 1, 1], [], []>} : vector<8x128xf32>, vector<128x128xf32>, vector<8x128xf32> -> vector<8x128xf32>
    %11 = vector.broadcast %2 : vector<1x128xf32> to vector<8x128xf32>
    %12 = arith.addf %10, %11 : vector<8x128xf32>
    %cst_13 = arith.constant 0.000000e+00 : f32
    %13 = vector.broadcast %cst_13 : f32 to vector<8x128xf32>
    %14 = arith.maximumf %12, %13 : vector<8x128xf32>
    %cst_14 = arith.constant dense<0.000000e+00> : vector<8x384xf32>
    %15 = tpu.matmul %14, %7, %cst_14 {dimension_numbers = #tpu.dot_dimension_numbers<[1], [0], [0], [1], [0, 0, 1, 1], [], []>} : vector<8x128xf32>, vector<128x384xf32>, vector<8x384xf32> -> vector<8x384xf32>
    %16 = vector.broadcast %3 : vector<1x384xf32> to vector<8x384xf32>
    %17 = arith.addf %15, %16 : vector<8x384xf32>
    %cst_15 = arith.constant dense<0.000000e+00> : vector<8x384xf32>
    %18 = tpu.matmul %1, %8, %cst_15 {dimension_numbers = #tpu.dot_dimension_numbers<[1], [0], [0], [1], [0, 0, 1, 1], [], []>} : vector<8x128xf32>, vector<128x384xf32>, vector<8x384xf32> -> vector<8x384xf32>
    %19 = vector.broadcast %4 : vector<1x384xf32> to vector<8x384xf32>
    %20 = arith.addf %18, %19 : vector<8x384xf32>
    %21 = vector.extract_strided_slice %17 {offsets = [0, 0], sizes = [8, 128], strides = [1, 1]} : vector<8x384xf32> to vector<8x128xf32>
    %22 = vector.extract_strided_slice %20 {offsets = [0, 0], sizes = [8, 128], strides = [1, 1]} : vector<8x384xf32> to vector<8x128xf32>
    %23 = arith.addf %21, %22 : vector<8x128xf32>
    %24 = arith.negf %23 : vector<8x128xf32>
    %25 = math.exp %24 : vector<8x128xf32>
    %cst_16 = arith.constant 1.000000e+00 : f32
    %26 = vector.broadcast %cst_16 : f32 to vector<8x128xf32>
    %27 = arith.addf %26, %25 : vector<8x128xf32>
    %28 = arith.divf %26, %27 : vector<8x128xf32>
    %29 = vector.extract_strided_slice %17 {offsets = [0, 128], sizes = [8, 128], strides = [1, 1]} : vector<8x384xf32> to vector<8x128xf32>
    %30 = vector.extract_strided_slice %20 {offsets = [0, 128], sizes = [8, 128], strides = [1, 1]} : vector<8x384xf32> to vector<8x128xf32>
    %31 = arith.addf %29, %30 : vector<8x128xf32>
    %32 = arith.negf %31 : vector<8x128xf32>
    %33 = math.exp %32 : vector<8x128xf32>
    %cst_17 = arith.constant 1.000000e+00 : f32
    %34 = vector.broadcast %cst_17 : f32 to vector<8x128xf32>
    %35 = arith.addf %34, %33 : vector<8x128xf32>
    %36 = arith.divf %34, %35 : vector<8x128xf32>
    %37 = vector.extract_strided_slice %17 {offsets = [0, 256], sizes = [8, 128], strides = [1, 1]} : vector<8x384xf32> to vector<8x128xf32>
    %38 = vector.extract_strided_slice %20 {offsets = [0, 256], sizes = [8, 128], strides = [1, 1]} : vector<8x384xf32> to vector<8x128xf32>
    %39 = arith.mulf %28, %38 : vector<8x128xf32>
    %40 = arith.addf %37, %39 : vector<8x128xf32>
    %41 = math.tanh %40 : vector<8x128xf32>
    %42 = arith.subf %1, %41 : vector<8x128xf32>
    %43 = arith.mulf %36, %42 : vector<8x128xf32>
    %44 = arith.addf %41, %43 : vector<8x128xf32>
    %cst_18 = arith.constant dense<0.000000e+00> : vector<8x128xf32>
    %45 = tpu.matmul %44, %9, %cst_18 {dimension_numbers = #tpu.dot_dimension_numbers<[1], [0], [0], [1], [0, 0, 1, 1], [], []>} : vector<8x128xf32>, vector<128x128xf32>, vector<8x128xf32> -> vector<8x128xf32>
    %46 = vector.broadcast %5 : vector<1x128xf32> to vector<8x128xf32>
    %47 = arith.addf %45, %46 : vector<8x128xf32>
    %c0_19 = arith.constant 0 : index
    %c0_20 = arith.constant 0 : index
    %48 = vector.load %arg5[%c0_19, %c0_20] : memref<8x128xf32, #tpu.memory_space<vmem>>, vector<8x128xf32>
    tpu.vector_store %arg5[%c0_19, %c0_20], %47 {strides = array<i32>} : memref<8x128xf32, #tpu.memory_space<vmem>>, vector<8x128xf32>,
    %c0_21 = arith.constant 0 : index
    %c0_22 = arith.constant 0 : index
    %49 = vector.load %arg6[%c0_21, %c0_22] : memref<8x128xf32, #tpu.memory_space<vmem>>, vector<8x128xf32>
    tpu.vector_store %arg6[%c0_21, %c0_22], %44 {strides = array<i32>} : memref<8x128xf32, #tpu.memory_space<vmem>>, vector<8x128xf32>,
    return
  }
  func.func @transform_0(%arg0: i32) -> (i32, i32) {
    %c0_i32 = arith.constant 0 : i32
    %c0_i32_0 = arith.constant 0 : i32
    return %arg0, %c0_i32 : i32, i32
  }
  func.func @transform_1(%arg0: i32) -> (i32, i32) {
    %c0_i32 = arith.constant 0 : i32
    %c0_i32_0 = arith.constant 0 : i32
    return %arg0, %c0_i32 : i32, i32
  }
  func.func @transform_2(%arg0: i32) -> (i32, i32) {
    %c0_i32 = arith.constant 0 : i32
    %c0_i32_0 = arith.constant 0 : i32
    %c0_i32_1 = arith.constant 0 : i32
    return %c0_i32, %c0_i32_0 : i32, i32
  }
  func.func @transform_3(%arg0: i32) -> (i32, i32) {
    %c0_i32 = arith.constant 0 : i32
    %c0_i32_0 = arith.constant 0 : i32
    %c0_i32_1 = arith.constant 0 : i32
    return %c0_i32, %c0_i32_0 : i32, i32
  }
  func.func @transform_4(%arg0: i32) -> (i32, i32) {
    %c0_i32 = arith.constant 0 : i32
    %c0_i32_0 = arith.constant 0 : i32
    return %arg0, %c0_i32 : i32, i32
  }
  func.func @transform_5(%arg0: i32) -> (i32, i32) {
    %c0_i32 = arith.constant 0 : i32
    %c0_i32_0 = arith.constant 0 : i32
    return %arg0, %c0_i32 : i32, i32
  }
}

</mosaic_0001>

<bundles_post_ra>
// kernel: rnn_agent_forward_padded.1
= control target key start
LH: loop header
LB: loop body
LE: loop exit
PB: predicated region body
PF: predicated region fallthrough
CT: control target
= control target key end

     0   :  { %11 = vsyncpa [#allocation3], 0  ;;  %s1365_s0 = inlined_call_operand.vmem [shape: f32[8,128], index: 0, kind: input, shape index: {}]   ;;  %s1366_s1 = inlined_call_operand.hbm [shape: f32[8,128], index: 1, kind: input, shape index: {}, may-alias: {1,5}]   ;;  %s1367_s2 = inlined_call_operand.hbm [shape: f32[128,1024], index: 2, kind: input, shape index: {}]   ;;  %s1368_s3 = inlined_call_operand.hbm [shape: f32[8,384], index: 3, kind: input, shape index: {}]   ;;  %s1369_s4 = inlined_call_operand.hbm [shape: f32[8,128], index: 4, kind: output, shape index: {0}]   ;;  %s1370_s5 = inlined_call_operand.hbm [shape: f32[8,128], index: 5, kind: output, shape index: {1}, may-alias: {1,5}]  }
   0x1   :  { %12 = vsyncpa [#allocation6], 0 }
   0x2   :  { %13 = vsyncpa [#allocation4], 0 }
   0x3   :  { %14 = vsyncpa [#allocation10], 0  ;;  %s1215_s18 = smov [#allocation5]   ;;  %s1097_s22 = scalar_lea.hbm %s1367_s2, 16384 }
   0x4   :  { %s32_s19 = sshll.u32 %s1215_s18, 4  ;;  %p1098_p0 = scmp.ne.s32.totalorder %s1367_s2, %s1097_s22  ;;  %s33_s19 = int_to_ptr.vmem [resolvable:$true] %s32_s19 }
   0x5   :  { %p1101_p1 = scmp.lt.u32.totalorder %s1097_s22, %s1367_s2 }
   0x7   :  { %p1103_p2 = pnand %p1101_p1, %p1098_p0 }
   0x9   :  { %1106 = shalt.err (!%p1103_p2)
}
   0xa   :  { %s1107_s27 = scalar_lea.vmem %s33_s19, 16384  ;;  %p1112_p4 = scmp.lt.s32.totalorder %s33_s19, %s33_s19 }
   0xb   :  { %p1108_p3 = scmp.ne.s32.totalorder %s33_s19, %s1107_s27  ;;  %p1113_p5 = scmp.lt.s32.totalorder %s1107_s27, %s1107_s27 }
   0xd   :  { %p1114_p6 = por %p1113_p5, %p1112_p4 }
   0xf   :  { %p1115_p7 = pnand %p1114_p6, %p1108_p3 }
  0x11   :  { %1118 = shalt.err (!%p1115_p7)
}
  0x12   :  { %s1216_s28 = smov 1024   ;;  %s1217_s29 = smov 64  }
  0x13   :  { %38 = dma.hbm_to_vmem [thread:$0]  %s1367_s2, 16384, %s33_s19, [#allocation6], %s1216_s28, %s1216_s28, %s1217_s29  }
  0x14   :  { %s1218_s7 = smov [#allocation2]   ;;  %s1219_s9 = smov [#allocation7]  }
  0x15   :  { %s23_s8 = sshll.u32 %s1218_s7, 4  ;;  %s45_s10 = sshll.u32 %s1219_s9, 4  ;;  %s24_s8 = int_to_ptr.vmem [resolvable:$true] %s23_s8  ;;  %s46_s10 = int_to_ptr.vmem [resolvable:$true] %s45_s10 }
  0x16   :  { %s1119_s13 = scalar_lea.hbm %s1366_s1, 128 }
  0x17   :  { %p1120_p8 = scmp.ne.s32.totalorder %s1366_s1, %s1119_s13  ;;  %p1123_p9 = scmp.lt.u32.totalorder %s1119_s13, %s1366_s1 }
  0x19   :  { %p1125_p10 = pnand %p1123_p9, %p1120_p8 }
  0x1b   :  { %1128 = shalt.err (!%p1125_p10)
}
  0x1c   :  { %s1129_s2 = scalar_lea.vmem %s24_s8, 128  ;;  %p1134_p12 = scmp.lt.s32.totalorder %s24_s8, %s24_s8 }
  0x1d   :  { %p1130_p11 = scmp.ne.s32.totalorder %s24_s8, %s1129_s2  ;;  %p1135_p13 = scmp.lt.s32.totalorder %s1129_s2, %s1129_s2 }
  0x1f   :  { %p1136_p0 = por %p1135_p13, %p1134_p12 }
  0x21   :  { %p1137_p1 = pnand %p1136_p0, %p1130_p11 }
  0x23   :  { %1140 = shalt.err (!%p1137_p1)
}
  0x24   :  { %26 = dma.hbm_to_vmem [thread:$0]  %s1366_s1, 128, %s24_s8, [#allocation3]  }
  0x25   :  { %s1141_s22 = scalar_lea.hbm %s1368_s3, 384 }
  0x26   :  { %p1142_p2 = scmp.ne.s32.totalorder %s1368_s3, %s1141_s22  ;;  %p1145_p3 = scmp.lt.u32.totalorder %s1141_s22, %s1368_s3 }
  0x28   :  { %p1147_p4 = pnand %p1145_p3, %p1142_p2 }
  0x2a   :  { %1150 = shalt.err (!%p1147_p4)
}
  0x2b   :  { %s1151_s27 = scalar_lea.vmem %s46_s10, 384  ;;  %p1156_p6 = scmp.lt.s32.totalorder %s46_s10, %s46_s10 }
  0x2c   :  { %p1152_p5 = scmp.ne.s32.totalorder %s46_s10, %s1151_s27  ;;  %p1157_p7 = scmp.lt.s32.totalorder %s1151_s27, %s1151_s27 }
  0x2e   :  { %p1158_p8 = por %p1157_p7, %p1156_p6 }
  0x30   :  { %p1159_p9 = pnand %p1158_p8, %p1152_p5 }
  0x32   :  { %1162 = shalt.err (!%p1159_p9)
}
  0x33   :  { %48 = dma.hbm_to_vmem [thread:$0]  %s1368_s3, 384, %s46_s10, [#allocation6]  }
  0x34   :  { %1207 = dma.done.wait [#allocation3], 128  }
  0x35   :  { %1208 = vsyncadd [#allocation3], 4294967168 }
  0x36   :  { %1209 = dma.done.wait [#allocation6], 16768  }
  0x37   :  { %1210 = vsyncadd [#allocation6], 4294950528  ;;  %v1220_v0 = vmov 0.0|0.0   ;;  %vm1221_vm0 = vmmov 0   ;;  %v1222_v1 = vmov 0.0   ;;  %v66_v2 = vld [vmem:[#allocation5] sm:$0xff] }
  0x38   :  { %911 = vmatprep.subr.bf16.mxu0 %v1220_v0  ;;  %803 = vmatprep.mubr.msk.f32.mxu0 %vm1221_vm0, %v1222_v1  ;;  %v67_v3 = vld [vmem:[#allocation5 + $0x40] sm:$0xff]  ;;  %v83_v10 = vld [vmem:[#allocation5 + $0x10] sm:$0xff]  ;;  %v82_v12 = vld [vmem:[#allocation5 + $0x8] sm:$0xff] }
  0x39   :  { %345 = vmatprep.mubr.f32.mxu1 %v1222_v1  ;;  %v68_v4 = vld [vmem:[#allocation5 + $0x80] sm:$0xff]  ;;  %v912_v5 = vpack.c.bf16 %v67_v3, %v66_v2  ;;  %v86_v11 = vld [vmem:[#allocation5 + $0x50] sm:$0xff]  ;;  %v85_v13 = vld [vmem:[#allocation5 + $0x48] sm:$0xff] }
  0x3a   :  { %v69_v6 = vld [vmem:[#allocation5 + $0xc0] sm:$0xff]  ;;  %v935_v17 = vpack.c.bf16 %v86_v11, %v83_v10  ;;  %v937_v18 = vpack.c.bf16 %v85_v13, %v82_v12  ;;  %v89_v19 = vld [vmem:[#allocation5 + $0x90] sm:$0xff]  ;;  %v88_v21 = vld [vmem:[#allocation5 + $0x88] sm:$0xff] }
  0x3b   :  { %913 = vmatpush3.bf16.msra.mxu0 %v912_v5  ;;  %v915_v7 = vpack.c.bf16 %v69_v6, %v68_v4  ;;  %v70_v8 = vld [vmem:[#allocation5 + $0x100] sm:$0xff]  ;;  %v92_v20 = vld [vmem:[#allocation5 + $0xd0] sm:$0xff]  ;;  %v91_v22 = vld [vmem:[#allocation5 + $0xc8] sm:$0xff] }
  0x3c   :  { %914 = vmatprep.subr.bf16.mxu0 %v1220_v0  ;;  %v71_v9 = vld [vmem:[#allocation5 + $0x140] sm:$0xff]  ;;  %936 = vmatprep.subr.bf16.mxu1 %v935_v17  ;;  %v939_v23 = vpack.c.bf16 %v92_v20, %v89_v19  ;;  %v95_v24 = vld [vmem:[#allocation5 + $0x110] sm:$0xff]  ;;  %v941_v25 = vpack.c.bf16 %v91_v22, %v88_v21  ;;  %v94_v30 = vld [vmem:[#allocation5 + $0x108] sm:$0xff] }
  0x3d   :  { %v918_v14 = vpack.c.bf16 %v71_v9, %v70_v8  ;;  %v72_v15 = vld [vmem:[#allocation5 + $0x180] sm:$0xff]  ;;  %938 = vmatpush1.bf16.msra.mxu1 %v937_v18  ;;  %v98_v26 = vld [vmem:[#allocation5 + $0x150] sm:$0xff]  ;;  %v97_v31 = vld [vmem:[#allocation5 + $0x148] sm:$0xff] }
  0x3e   :  { %v73_v16 = vld [vmem:[#allocation5 + $0x1c0] sm:$0xff]  ;;  %940 = vmatprep.subr.bf16.mxu1 %v939_v23  ;;  %v943_v29 = vpack.c.bf16 %v98_v26, %v95_v24  ;;  %v101_v33 = vld [vmem:[#allocation5 + $0x190] sm:$0xff]  ;;  %v945_v35 = vpack.c.bf16 %v97_v31, %v94_v30  ;;  %v100_v39 = vld [vmem:[#allocation5 + $0x188] sm:$0xff] }
  0x3f   :  { %916 = vmatpush3.bf16.msra.mxu0 %v915_v7  ;;  %v921_v27 = vpack.c.bf16 %v73_v16, %v72_v15  ;;  %v74_v28 = vld [vmem:[#allocation5 + $0x200] sm:$0xff]  ;;  %v104_v34 = vld [vmem:[#allocation5 + $0x1d0] sm:$0xff]  ;;  %v103_v40 = vld [vmem:[#allocation5 + $0x1c8] sm:$0xff] }
  0x40   :  { %917 = vmatprep.subr.bf16.mxu0 %v1220_v0  ;;  %v75_v32 = vld [vmem:[#allocation5 + $0x240] sm:$0xff]  ;;  %v947_v38 = vpack.c.bf16 %v104_v34, %v101_v33  ;;  %v107_v42 = vld [vmem:[#allocation5 + $0x210] sm:$0xff]  ;;  %v949_v44 = vpack.c.bf16 %v103_v40, %v100_v39  ;;  %v106_v48 = vld [vmem:[#allocation5 + $0x208] sm:$0xff] }
  0x41   :  { %942 = vmatpush1.bf16.msra.mxu1 %v941_v25  ;;  %v924_v36 = vpack.c.bf16 %v75_v32, %v74_v28  ;;  %v76_v37 = vld [vmem:[#allocation5 + $0x280] sm:$0xff]  ;;  %v110_v43 = vld [vmem:[#allocation5 + $0x250] sm:$0xff]  ;;  %v109_v49 = vld [vmem:[#allocation5 + $0x248] sm:$0xff] }
  0x42   :  { %944 = vmatprep.subr.bf16.mxu1 %v943_v29  ;;  %v77_v41 = vld [vmem:[#allocation5 + $0x2c0] sm:$0xff]  ;;  %v951_v47 = vpack.c.bf16 %v110_v43, %v107_v42  ;;  %v113_v51 = vld [vmem:[#allocation5 + $0x290] sm:$0xff]  ;;  %v953_v53 = vpack.c.bf16 %v109_v49, %v106_v48  ;;  %v112_v57 = vld [vmem:[#allocation5 + $0x288] sm:$0xff] }
  0x43   :  { %919 = vmatpush3.bf16.msra.mxu0 %v918_v14  ;;  %v927_v45 = vpack.c.bf16 %v77_v41, %v76_v37  ;;  %v78_v46 = vld [vmem:[#allocation5 + $0x300] sm:$0xff]  ;;  %v116_v52 = vld [vmem:[#allocation5 + $0x2d0] sm:$0xff]  ;;  %v115_v58 = vld [vmem:[#allocation5 + $0x2c8] sm:$0xff] }
  0x44   :  { %920 = vmatprep.subr.bf16.mxu0 %v1220_v0  ;;  %v79_v50 = vld [vmem:[#allocation5 + $0x340] sm:$0xff]  ;;  %v955_v56 = vpack.c.bf16 %v116_v52, %v113_v51  ;;  %v119_v60 = vld [vmem:[#allocation5 + $0x310] sm:$0xff]  ;;  %v957_v62 = vpack.c.bf16 %v115_v58, %v112_v57  ;;  %v118_v3 = vld [vmem:[#allocation5 + $0x308] sm:$0xff] }
  0x45   :  { %946 = vmatpush1.bf16.msra.mxu1 %v945_v35  ;;  %v930_v54 = vpack.c.bf16 %v79_v50, %v78_v46  ;;  %v80_v55 = vld [vmem:[#allocation5 + $0x380] sm:$0xff]  ;;  %v122_v61 = vld [vmem:[#allocation5 + $0x350] sm:$0xff]  ;;  %v121_v4 = vld [vmem:[#allocation5 + $0x348] sm:$0xff] }
  0x46   :  { %948 = vmatprep.subr.bf16.mxu1 %v947_v38  ;;  %v81_v59 = vld [vmem:[#allocation5 + $0x3c0] sm:$0xff]  ;;  %v959_v2 = vpack.c.bf16 %v122_v61, %v119_v60  ;;  %v84_v5 = vld [vmem:[#allocation5 + $0x18] sm:$0xff]  ;;  %v961_v7 = vpack.c.bf16 %v121_v4, %v118_v3  ;;  %v125_v28 = vld [vmem:[#allocation5 + $0x390] sm:$0xff] }
  0x47   :  { %922 = vmatpush3.bf16.msra.mxu0 %v921_v27  ;;  %v933_v63 = vpack.c.bf16 %v81_v59, %v80_v55  ;;  %v87_v6 = vld [vmem:[#allocation5 + $0x58] sm:$0xff]  ;;  %v128_v29 = vld [vmem:[#allocation5 + $0x3d0] sm:$0xff]  ;;  %v124_v31 = vld [vmem:[#allocation5 + $0x388] sm:$0xff] }
  0x48   :  { %923 = vmatprep.subr.bf16.mxu0 %v1220_v0  ;;  %v58_v8 = vld [vmem:[%s1365_s0] sm:$0xff]  ;;  %v968_v9 = vpack.c.bf16 %v87_v6, %v84_v5  ;;  %v963_v30 = vpack.c.bf16 %v128_v29, %v125_v28  ;;  %v127_v32 = vld [vmem:[#allocation5 + $0x3c8] sm:$0xff]  ;;  %v60_v40 = vld [vmem:[#allocation7] ss:$0 sm:$0xff]  ;;  %s1223_s0 = smov [#allocation9]  }
  0x49   :  { %950 = vmatpush1.bf16.msra.mxu1 %v949_v44  ;;  %v90_v10 = vld [vmem:[#allocation5 + $0x98] sm:$0xff]  ;;  %v965_v33 = vpack.c.bf16 %v127_v32, %v124_v31  ;;  %v131_v37 = vld [vmem:[#allocation5 + $0x28] sm:$0xff]  ;;  %v130_v41 = vld [vmem:[#allocation5 + $0x20] sm:$0xff]  ;;  %s687_s30 = sshll.u32 %s1223_s0, 4  ;;  %s688_s30 = int_to_ptr.vmem [resolvable:$true] %s687_s30 }
  0x4a   :  { %952 = vmatprep.subr.bf16.mxu1 %v951_v47  ;;  %v93_v11 = vld [vmem:[#allocation5 + $0xd8] sm:$0xff]  ;;  %v134_v38 = vld [vmem:[#allocation5 + $0x68] sm:$0xff]  ;;  %v133_v42 = vld [vmem:[#allocation5 + $0x60] sm:$0xff]  ;;  %s1163_s6 = scalar_lea.vmem %s688_s30, 128  ;;  %p1168_p11 = scmp.lt.s32.totalorder %s688_s30, %s688_s30 }
  0x4b   :  { %925 = vmatpush3.bf16.msra.mxu0 %v924_v36  ;;  %v971_v12 = vpack.c.bf16 %v93_v11, %v90_v10  ;;  %v96_v13 = vld [vmem:[#allocation5 + $0x118] sm:$0xff]  ;;  %v991_v39 = vpack.c.bf16 %v134_v38, %v131_v37  ;;  %v132_v43 = vld [vmem:[#allocation5 + $0x30] sm:$0xff]  ;;  %v137_v46 = vld [vmem:[#allocation5 + $0xa8] sm:$0xff]  ;;  %v993_v50 = vpack.c.bf16 %v133_v42, %v130_v41  ;;  %p1164_p10 = scmp.ne.s32.totalorder %s688_s30, %s1163_s6  ;;  %p1169_p12 = scmp.lt.s32.totalorder %s1163_s6, %s1163_s6 }
  0x4c   :  { %926 = vmatprep.subr.bf16.mxu0 %v1220_v0  ;;  %v99_v14 = vld [vmem:[#allocation5 + $0x158] sm:$0xff]  ;;  %v135_v44 = vld [vmem:[#allocation5 + $0x70] sm:$0xff]  ;;  %v140_v47 = vld [vmem:[#allocation5 + $0xe8] sm:$0xff] }
  0x4d   :  { %954 = vmatpush1.bf16.msra.mxu1 %v953_v53  ;;  %v974_v15 = vpack.c.bf16 %v99_v14, %v96_v13  ;;  %v102_v16 = vld [vmem:[#allocation5 + $0x198] sm:$0xff]  ;;  %v136_v51 = vld [vmem:[#allocation5 + $0xa0] sm:$0xff]  ;;  %v1024_v52 = vpack.c.bf16 %v135_v44, %v132_v43  ;;  %v141_v57 = vld [vmem:[#allocation5 + $0xf0] sm:$0xff]  ;;  %p1170_p13 = por %p1169_p12, %p1168_p11 }
  0x4e   :  { %956 = vmatprep.subr.bf16.mxu1 %v955_v56  ;;  %v105_v17 = vld [vmem:[#allocation5 + $0x1d8] sm:$0xff]  ;;  %v139_v55 = vld [vmem:[#allocation5 + $0xe0] sm:$0xff]  ;;  %v138_v56 = vld [vmem:[#allocation5 + $0xb0] sm:$0xff] }
  0x4f   :  { %928 = vmatpush3.bf16.msra.mxu0 %v927_v45  ;;  %v977_v18 = vpack.c.bf16 %v105_v17, %v102_v16  ;;  %v108_v19 = vld [vmem:[#allocation5 + $0x218] sm:$0xff]  ;;  %v143_v58 = vld [vmem:[#allocation5 + $0x128] sm:$0xff]  ;;  %v997_v60 = vpack.c.bf16 %v139_v55, %v136_v51  ;;  %v142_v61 = vld [vmem:[#allocation5 + $0x120] sm:$0xff]  ;;  %p1171_p0 = pnand %p1170_p13, %p1164_p10 }
  0x50   :  { %929 = vmatprep.subr.bf16.mxu0 %v1220_v0  ;;  %v111_v20 = vld [vmem:[#allocation5 + $0x258] sm:$0xff]  ;;  %v146_v59 = vld [vmem:[#allocation5 + $0x168] sm:$0xff]  ;;  %v144_v3 = vld [vmem:[#allocation5 + $0x130] sm:$0xff] }
  0x51   :  { %958 = vmatpush1.bf16.msra.mxu1 %v957_v62  ;;  %v980_v21 = vpack.c.bf16 %v111_v20, %v108_v19  ;;  %v114_v22 = vld [vmem:[#allocation5 + $0x298] sm:$0xff]  ;;  %v1027_v62 = vpack.c.bf16 %v141_v57, %v138_v56  ;;  %v147_v4 = vld [vmem:[#allocation5 + $0x170] sm:$0xff]  ;;  %v149_v5 = vld [vmem:[#allocation5 + $0x1a8] sm:$0xff] }
  0x52   :  { %960 = vmatprep.subr.bf16.mxu1 %v959_v2  ;;  %v117_v23 = vld [vmem:[#allocation5 + $0x2d8] sm:$0xff]  ;;  %v145_v2 = vld [vmem:[#allocation5 + $0x160] sm:$0xff]  ;;  %v152_v6 = vld [vmem:[#allocation5 + $0x1e8] sm:$0xff] }
  0x53   :  { %931 = vmatpush3.bf16.msra.mxu0 %v930_v54  ;;  %v983_v24 = vpack.c.bf16 %v117_v23, %v114_v22  ;;  %v120_v25 = vld [vmem:[#allocation5 + $0x318] sm:$0xff]  ;;  %v995_v54 = vpack.c.bf16 %v140_v47, %v137_v46  ;;  %v1003_v10 = vpack.c.bf16 %v152_v6, %v149_v5  ;;  %v151_v11 = vld [vmem:[#allocation5 + $0x1e0] sm:$0xff]  ;;  %v153_v13 = vld [vmem:[#allocation5 + $0x1f0] sm:$0xff] }
  0x54   :  { %932 = vmatprep.subr.bf16.mxu0 %v1220_v0  ;;  %v123_v26 = vld [vmem:[#allocation5 + $0x358] sm:$0xff]  ;;  %v155_v14 = vld [vmem:[#allocation5 + $0x228] sm:$0xff]  ;;  %v154_v17 = vld [vmem:[#allocation5 + $0x220] sm:$0xff] }
  0x55   :  { %962 = vmatpush1.bf16.msra.mxu1 %v961_v7  ;;  %v986_v27 = vpack.c.bf16 %v123_v26, %v120_v25  ;;  %v126_v34 = vld [vmem:[#allocation5 + $0x398] sm:$0xff]  ;;  %v1001_v7 = vpack.c.bf16 %v145_v2, %v142_v61  ;;  %v157_v20 = vld [vmem:[#allocation5 + $0x260] sm:$0xff]  ;;  %v159_v22 = vld [vmem:[#allocation5 + $0x270] sm:$0xff] }
  0x56   :  { %v129_v35 = vld [vmem:[#allocation5 + $0x3d8] sm:$0xff]  ;;  %964 = vmatprep.subr.bf16.mxu1 %v963_v30  ;;  %v161_v23 = vld [vmem:[#allocation5 + $0x2a8] sm:$0xff]  ;;  %v1009_v25 = vpack.c.bf16 %v157_v20, %v154_v17  ;;  %v160_v26 = vld [vmem:[#allocation5 + $0x2a0] sm:$0xff] }
  0x57   :  { %934 = vmatpush3.bf16.msra.mxu0 %v933_v63  ;;  %v989_v36 = vpack.c.bf16 %v129_v35, %v126_v34  ;;  %v999_v63 = vpack.c.bf16 %v146_v59, %v143_v58  ;;  %v163_v29 = vld [vmem:[#allocation5 + $0x2e0] sm:$0xff]  ;;  %v162_v30 = vld [vmem:[#allocation5 + $0x2b0] sm:$0xff]  ;;  %v167_v32 = vld [vmem:[#allocation5 + $0x328] sm:$0xff] }
  0x58   :  { %967 = vmatprep.subr.bf16.mxu0 %v1220_v0  ;;  %v165_v31 = vld [vmem:[#allocation5 + $0x2f0] sm:$0xff]  ;;  %v1013_v34 = vpack.c.bf16 %v163_v29, %v160_v26  ;;  %v166_v35 = vld [vmem:[#allocation5 + $0x320] sm:$0xff]  ;;  %v173_v41 = vld [vmem:[#allocation5 + $0x3a8] sm:$0xff] }
  0x59   :  { %966 = vmatpush1.bf16.msra.mxu1 %v965_v33  ;;  %v170_v33 = vld [vmem:[#allocation5 + $0x368] sm:$0xff]  ;;  %v169_v38 = vld [vmem:[#allocation5 + $0x360] sm:$0xff]  ;;  %v180_v56 = vld [vmem:[#allocation5 + $0xb8] sm:$0xff] }
  0x5a   :  { %804 = vmatmul.mubr.f32.vlgmr.msra.gmra.mrb[0].mxu0 %v58_v8  ;;  %992 = vmatprep.subr.bf16.mxu1 %v991_v39  ;;  %v148_v8 = vld [vmem:[#allocation5 + $0x1a0] sm:$0xff]  ;;  %v1015_v37 = vpack.c.bf16 %v170_v33, %v167_v32  ;;  %v168_v39 = vld [vmem:[#allocation5 + $0x330] sm:$0xff]  ;;  %v176_v42 = vld [vmem:[#allocation5 + $0x3e8] sm:$0xff]  ;;  %v1017_v43 = vpack.c.bf16 %v169_v38, %v166_v35 }
  0x5b   :  { %969 = vmatpush3.bf16.msra.mxu0 %v968_v9  ;;  %838 = vmatprep.mubr.msk.f32.mxu0 %vm1221_vm0, %v1222_v1  ;;  %v1030_v9 = vpack.c.bf16 %v147_v4, %v144_v3  ;;  %v1005_v16 = vpack.c.bf16 %v151_v11, %v148_v8  ;;  %v172_v44 = vld [vmem:[#allocation5 + $0x3a0] sm:$0xff]  ;;  %v1019_v46 = vpack.c.bf16 %v176_v42, %v173_v41  ;;  %v181_v57 = vld [vmem:[#allocation5 + $0xf8] sm:$0xff] }
  0x5c   :  { %970 = vmatprep.subr.bf16.mxu0 %v1220_v0  ;;  %v175_v47 = vld [vmem:[#allocation5 + $0x3e0] sm:$0xff]  ;;  %v1051_v58 = vpack.c.bf16 %v181_v57, %v180_v56  ;;  %v182_v59 = vld [vmem:[#allocation5 + $0x138] sm:$0xff] }
  0x5d   :  { %v186_v2 = vld [vmem:[#allocation5 + $0x238] sm:$0xff]  ;;  %v62_v20 = vld [vmem:[#allocation7 + $0x1] ss:$8 sm:$0x7] }
  0x5e   :  { %v187_v3 = vld [vmem:[#allocation5 + $0x278] sm:$0xff] }
  0x5f   :  { %972 = vmatpush3.bf16.msra.mxu0 %v971_v12  ;;  %v150_v12 = vld [vmem:[#allocation5 + $0x1b0] sm:$0xff]  ;;  %v1060_v4 = vpack.c.bf16 %v187_v3, %v186_v2  ;;  %v188_v5 = vld [vmem:[#allocation5 + $0x2b8] sm:$0xff] }
  0x60   :  { %973 = vmatprep.subr.bf16.mxu0 %v1220_v0  ;;  %v189_v6 = vld [vmem:[#allocation5 + $0x2f8] sm:$0xff] }
  0x61   :  { %v190_v8 = vld [vmem:[#allocation5 + $0x338] sm:$0xff] }
  0x62   :  { %v192_v11 = vld [vmem:[#allocation5 + $0x3b8] sm:$0xff] }
  0x63   :  { %975 = vmatpush3.bf16.msra.mxu0 %v974_v15  ;;  %v158_v15 = vld [vmem:[#allocation5 + $0x268] sm:$0xff] }
  0x64   :  { %976 = vmatprep.subr.bf16.mxu0 %v1220_v0  ;;  %v1007_v19 = vpack.c.bf16 %v158_v15, %v155_v14 }
  0x67   :  { %978 = vmatpush3.bf16.msra.mxu0 %v977_v18  ;;  %v1033_v18 = vpack.c.bf16 %v153_v13, %v150_v12  ;;  %v193_v12 = vld [vmem:[#allocation5 + $0x3f8] sm:$0xff] }
  0x68   :  { %979 = vmatprep.subr.bf16.mxu0 %v1220_v0  ;;  %v1069_v13 = vpack.c.bf16 %v193_v12, %v192_v11 }
  0x6b   :  { %981 = vmatpush3.bf16.msra.mxu0 %v980_v21  ;;  %v156_v21 = vld [vmem:[#allocation5 + $0x230] sm:$0xff] }
  0x6c   :  { %982 = vmatprep.subr.bf16.mxu0 %v1220_v0 }
  0x6f   :  { %984 = vmatpush3.bf16.msra.mxu0 %v983_v24  ;;  %v164_v24 = vld [vmem:[#allocation5 + $0x2e8] sm:$0xff] }
  0x70   :  { %985 = vmatprep.subr.bf16.mxu0 %v1220_v0  ;;  %v1011_v28 = vpack.c.bf16 %v164_v24, %v161_v23 }
  0x73   :  { %987 = vmatpush3.bf16.msra.mxu0 %v986_v27  ;;  %v1036_v27 = vpack.c.bf16 %v159_v22, %v156_v21 }
  0x74   :  { %988 = vmatprep.subr.bf16.mxu0 %v1220_v0 }
  0x77   :  { %990 = vmatpush3.bf16.msra.mxu0 %v989_v36  ;;  %v1039_v36 = vpack.c.bf16 %v165_v31, %v162_v30 }
  0x78   :  { %1023 = vmatprep.subr.bf16.mxu0 %v1220_v0 }
 0x12d   :  { %v260_v45 = vpop.f32.mrb[0].mxu0 }
 0x12e   :  { %v261_v48 = vadd.f32 %v260_v45, %v60_v40  ;;  %v805_v49 = vpop.f32.mrb[1].mxu0  ;;  %v171_v40 = vld [vmem:[#allocation5 + $0x370] sm:$0xff] }
 0x12f   :  { %v1042_v45 = vpack.c.bf16 %v171_v40, %v168_v39  ;;  %v177_v49 = vld [vmem:[#allocation5 + $0x3f0] sm:$0xff] }
 0x130   :  { %v264_v53 = vmax.f32 %v261_v48, 0.0  ;;  %v174_v48 = vld [vmem:[#allocation5 + $0x3b0] sm:$0xff] }
 0x131   :  { %v1045_v51 = vpack.c.bf16 %v177_v49, %v174_v48 }
 0x132   :  { %346 = vmatmul.mubr.f32.vlgmr.msra.gmra.mrb[0].mxu1 %v264_v53  ;;  %839 = vmatmul.mubr.f32.vlgmr.msra.gmra.mrb[2].mxu0 %v264_v53  ;;  %v178_v53 = vld [vmem:[#allocation5 + $0x38] sm:$0xff] }
 0x133   :  { %994 = vmatpush1.bf16.msra.mxu1 %v993_v50  ;;  %1025 = vmatpush3.bf16.msra.mxu0 %v1024_v52  ;;  %v1021_v50 = vpack.c.bf16 %v175_v47, %v172_v44  ;;  %v1326_v52 = vld [vmem:[#allocation2] sm:$0xff] }
 0x134   :  { %996 = vmatprep.subr.bf16.mxu1 %v995_v54  ;;  %1026 = vmatprep.subr.bf16.mxu0 %v1220_v0  ;;  %v179_v54 = vld [vmem:[#allocation5 + $0x78] sm:$0xff] }
 0x135   :  { %502 = vmatprep.mubr.f32.mxu1 %v1222_v1  ;;  %873 = vmatprep.mubr.msk.f32.mxu0 %vm1221_vm0, %v1222_v1  ;;  %v1048_v55 = vpack.c.bf16 %v179_v54, %v178_v53 }
 0x137   :  { %998 = vmatpush1.bf16.msra.mxu1 %v997_v60  ;;  %1028 = vmatpush3.bf16.msra.mxu0 %v1027_v62  ;;  %v183_v60 = vld [vmem:[#allocation5 + $0x178] sm:$0xff] }
 0x138   :  { %1000 = vmatprep.subr.bf16.mxu1 %v999_v63  ;;  %1029 = vmatprep.subr.bf16.mxu0 %v1220_v0  ;;  %v1054_v61 = vpack.c.bf16 %v183_v60, %v182_v59  ;;  %v184_v62 = vld [vmem:[#allocation5 + $0x1b8] sm:$0xff] }
 0x13b   :  { %1002 = vmatpush1.bf16.msra.mxu1 %v1001_v7  ;;  %1031 = vmatpush3.bf16.msra.mxu0 %v1030_v9  ;;  %v1063_v7 = vpack.c.bf16 %v189_v6, %v188_v5  ;;  %v191_v9 = vld [vmem:[#allocation5 + $0x378] sm:$0xff] }
 0x13c   :  { %1004 = vmatprep.subr.bf16.mxu1 %v1003_v10  ;;  %1032 = vmatprep.subr.bf16.mxu0 %v1220_v0  ;;  %v1066_v10 = vpack.c.bf16 %v191_v9, %v190_v8 }
 0x13f   :  { %1006 = vmatpush1.bf16.msra.mxu1 %v1005_v16  ;;  %1034 = vmatpush3.bf16.msra.mxu0 %v1033_v18  ;;  %v266_v16 = vlaneseq }
 0x140   :  { %1008 = vmatprep.subr.bf16.mxu1 %v1007_v19  ;;  %1035 = vmatprep.subr.bf16.mxu0 %v1220_v0  ;;  %v64_v19 = vld [vmem:[#allocation7 + $0x2] ss:$8 sm:$0x7] }
 0x141   :  { %v267_v17 = vshrl.u32 %v266_v16, 7 }
 0x143   :  { %1010 = vmatpush1.bf16.msra.mxu1 %v1009_v25  ;;  %1037 = vmatpush3.bf16.msra.mxu0 %v1036_v27  ;;  %v268_v18 = vsub.s32 0, %v267_v17  ;;  %v272_v24 = vsub.s32 1, %v267_v17 }
 0x144   :  { %1012 = vmatprep.subr.bf16.mxu1 %v1011_v28  ;;  %1038 = vmatprep.subr.bf16.mxu0 %v1220_v0 }
 0x145   :  { %v269_v21 = vrot.slane %v62_v20, %v268_v18  ;;  %v426_v22 = vrot.slane %v64_v19, %v268_v18  ;;  %v273_v28 = vrot.slane %v62_v20, %v272_v24  ;;  %v430_v29 = vrot.slane %v64_v19, %v272_v24 }
 0x147   :  { %1014 = vmatpush1.bf16.msra.mxu1 %v1013_v34  ;;  %1040 = vmatpush3.bf16.msra.mxu0 %v1039_v36  ;;  %v1071_v23 = vadd.f32 %v426_v22, %v269_v21  ;;  %v1073_v32 = vadd.f32 %v430_v29, %v273_v28 }
 0x148   :  { %1016 = vmatprep.subr.bf16.mxu1 %v1015_v37  ;;  %1041 = vmatprep.subr.bf16.mxu0 %v1220_v0  ;;  %v276_v37 = vsub.s32 2, %v267_v17 }
 0x14a   :  { %v434_v38 = vrot.slane %v64_v19, %v276_v37  ;;  %v277_v39 = vrot.slane %v62_v20, %v276_v37 }
 0x14b   :  { %1018 = vmatpush1.bf16.msra.mxu1 %v1017_v43  ;;  %1043 = vmatpush3.bf16.msra.mxu0 %v1042_v45 }
 0x14c   :  { %1020 = vmatprep.subr.bf16.mxu1 %v1019_v46  ;;  %1044 = vmatprep.subr.bf16.mxu0 %v1220_v0 }
 0x14f   :  { %1022 = vmatpush1.bf16.msra.mxu1 %v1021_v50  ;;  %1046 = vmatpush3.bf16.msra.mxu0 %v1045_v51 }
 0x150   :  { %1047 = vmatprep.subr.bf16.mxu1 %v1220_v0 }
 0x152   :  { %503 = vmatmul.mubr.f32.vlgmr.msra.gmra.mrb[0].mxu1 %v1326_v52  ;;  %874 = vmatmul.mubr.f32.vlgmr.msra.gmra.mrb[4].mxu0 %v1326_v52 }
 0x153   :  { %908 = vmatprep.mubr.msk.f32.mxu1 %vm1221_vm0, %v1222_v1  ;;  %1049 = vmatpush3.bf16.msra.mxu1 %v1048_v55  ;;  %v185_v1 = vld [vmem:[#allocation5 + $0x1f8] sm:$0xff] }
 0x154   :  { %1050 = vmatprep.subr.bf16.mxu1 %v1220_v0  ;;  %v1057_v63 = vpack.c.bf16 %v185_v1, %v184_v62 }
 0x157   :  { %1052 = vmatpush3.bf16.msra.mxu1 %v1051_v58 }
 0x158   :  { %1053 = vmatprep.subr.bf16.mxu1 %v1220_v0 }
 0x15b   :  { %1055 = vmatpush3.bf16.msra.mxu1 %v1054_v61 }
 0x15c   :  { %1056 = vmatprep.subr.bf16.mxu1 %v1220_v0 }
 0x15f   :  { %1058 = vmatpush3.bf16.msra.mxu1 %v1057_v63 }
 0x160   :  { %1059 = vmatprep.subr.bf16.mxu1 %v1220_v0 }
 0x163   :  { %1061 = vmatpush3.bf16.msra.mxu1 %v1060_v4 }
 0x164   :  { %1062 = vmatprep.subr.bf16.mxu1 %v1220_v0 }
 0x167   :  { %1064 = vmatpush3.bf16.msra.mxu1 %v1063_v7 }
 0x168   :  { %1065 = vmatprep.subr.bf16.mxu1 %v1220_v0 }
 0x16b   :  { %1067 = vmatpush3.bf16.msra.mxu1 %v1066_v10 }
 0x16c   :  { %1068 = vmatprep.subr.bf16.mxu1 %v1220_v0 }
 0x16f   :  { %1070 = vmatpush3.bf16.msra.mxu1 %v1069_v13 }
 0x205   :  { %v418_v14 = vpop.f32.mrb[2].mxu0 }
 0x206   :  { %v840_v15 = vpop.f32.mrb[3].mxu0  ;;  %v419_v43 = vadd.f32 %v418_v14, %v277_v39 }
 0x225   :  { %v504_v25 = vpop.f32.mrb[0].mxu1  ;;  %v575_v26 = vpop.f32.mrb[4].mxu0 }
 0x226   :  { %v1072_v27 = vadd.f32 %v1071_v23, %v504_v25  ;;  %v506_v30 = vpop.f32.mrb[1].mxu1  ;;  %v875_v31 = vpop.f32.mrb[5].mxu0  ;;  %v576_v40 = vadd.f32 %v575_v26, %v434_v38 }
 0x227   :  { %v1074_v33 = vadd.f32 %v1073_v32, %v506_v30 }
 0x228   :  { %v701_v0 = vmul.f32 -1.442695, %v1072_v27 }
 0x229   :  { %v702_v34 = vmul.f32 -1.442695, %v1074_v33 }
 0x22a   :  { %1087 = vpow2.f32 %v701_v0 }
 0x22b   :  { %1089 = vpow2.f32 %v702_v34 }
 0x234   :  { %v1088_v35 = vpop.eup %1087 }
 0x235   :  { %v583_v36 = vadd.f32 1.0, %v1088_v35  ;;  %v1090_v41 = vpop.eup %1089 }
 0x236   :  { %v590_v45 = vadd.f32 1.0, %v1090_v41 }
 0x237   :  { %1091 = vrcp.f32 %v583_v36 }
 0x241   :  { %v1092_v42 = vpop.eup %1091 }
 0x242   :  { %v593_v44 = vmul.f32 %v1092_v42, %v576_v40 }
 0x244   :  { %v594_v46 = vadd.f32 %v593_v44, %v419_v43 }
 0x246   :  { %1093 = vtanh.f32 %v594_v46 }
 0x247   :  { %1095 = vrcp.f32 %v590_v45 }
 0x250   :  { %v1094_v47 = vpop.eup %1093 }
 0x251   :  { %v596_v48 = vsub.f32 %v1326_v52, %v1094_v47  ;;  %v1096_v49 = vpop.eup %1095 }
 0x253   :  { %v597_v50 = vmul.f32 %v1096_v49, %v596_v48 }
 0x255   :  { %v598_v51 = vadd.f32 %v1094_v47, %v597_v50 }
 0x257   :  { %909 = vmatmul.mubr.f32.vlgmr.msra.gmra.mrb[2].mxu1 %v598_v51  ;;  %670 = vst [vmem:[#allocation9] sm:$0xff] %v598_v51 }
 0x258   :  { %1174 = shalt.err (!%p1171_p0)
}
 0x259   :  { %s1175_s9 = scalar_lea.hbm %s1370_s5, 128 }
 0x25a   :  { %p1176_p1 = scmp.ne.s32.totalorder %s1370_s5, %s1175_s9  ;;  %p1179_p2 = scmp.lt.u32.totalorder %s1175_s9, %s1370_s5 }
 0x25c   :  { %p1181_p3 = pnand %p1179_p2, %p1176_p1 }
 0x25e   :  { %1184 = shalt.err (!%p1181_p3)
}
 0x25f   :  { %690 = dma.vmem_to_hbm [thread:$0]  %s688_s30, 128, %s1370_s5, [#allocation10]   ;;  %v65_v52 = vld [vmem:[#allocation7 + $0x3] ss:$0 sm:$0xff] }
 0x260   :  { %s1224_s16 = smov [#allocation8]  }
 0x261   :  { %s677_s17 = sshll.u32 %s1224_s16, 4  ;;  %s678_s17 = int_to_ptr.vmem [resolvable:$true] %s677_s17 }
 0x262   :  { %s1185_s2 = scalar_lea.vmem %s678_s17, 128  ;;  %p1190_p5 = scmp.lt.s32.totalorder %s678_s17, %s678_s17 }
 0x263   :  { %p1186_p4 = scmp.ne.s32.totalorder %s678_s17, %s1185_s2  ;;  %p1191_p6 = scmp.lt.s32.totalorder %s1185_s2, %s1185_s2 }
 0x265   :  { %p1192_p7 = por %p1191_p6, %p1190_p5 }
 0x267   :  { %p1193_p8 = pnand %p1192_p7, %p1186_p4 }
 0x32a   :  { %v665_v53 = vpop.f32.mrb[2].mxu1 }
 0x32b   :  { %v666_v54 = vadd.f32 %v665_v53, %v65_v52  ;;  %v910_v55 = vpop.f32.mrb[3].mxu1 }
 0x32d   :  { %669 = vst [vmem:[#allocation8] sm:$0xff] %v666_v54 }
 0x32e   :  { %1196 = shalt.err (!%p1193_p8)
}
 0x32f   :  { %s1197_s20 = scalar_lea.hbm %s1369_s4, 128 }
 0x330   :  { %p1198_p9 = scmp.ne.s32.totalorder %s1369_s4, %s1197_s20  ;;  %p1201_p10 = scmp.lt.u32.totalorder %s1197_s20, %s1369_s4 }
 0x332   :  { %p1203_p11 = pnand %p1201_p10, %p1198_p9 }
 0x334   :  { %1206 = shalt.err (!%p1203_p11)
}
 0x335   :  { %680 = dma.vmem_to_hbm [thread:$0]  %s678_s17, 128, %s1369_s4, [#allocation4]  }
 0x336   :  { %1211 = dma.done.wait [#allocation4], 128  }
 0x337   :  { %1212 = vsyncadd [#allocation4], 4294967168 }
 0x338   :  { %1213 = dma.done.wait [#allocation10], 128  }
 0x339   :  { %1214 = vsyncadd [#allocation10], 4294967168 }
 0x33a   :  { %697 = vsyncpa [#allocation3], 1 }
 0x33b   :  { %698 = vsyncpa [#allocation6], 1 }
 0x33c   :  { %699 = vsyncpa [#allocation4], 1 }
 0x33d   :  { %700 = vsyncpa [#allocation10], 1 }

</bundles_post_ra>
